<compile_context>
chip_gen: v7x
topology: tpu7x:2x2x1
jax: 0.10.0
libtpu: 0.0.40
codegen_flags: <defaults>
</compile_context>

<pallas_src>
import math

import jax
import jax.numpy as jnp
from jax.experimental import pallas as pl
from jax.experimental.pallas import tpu as pltpu

SCALE = math.sqrt(0.5)
_HEADROOM = 4 * 1024 * 1024
_MIN_STEPS = 4  # keep >= 4 grid steps when rows allow (2 TCs on v7x + pipelining)


def _phys_vmem_bytes():
    """Per-TensorCore VMEM capacity; conservative 64 MiB (v7x) if unknown."""
    try:
        info = pltpu.get_tpu_info()
        v = getattr(info, "vmem_capacity_bytes", None)
        if v:
            return int(v)
    except Exception:
        pass
    return 64 * 1024 * 1024


def _sublane(dtype):
    # Packed tile height: 8 rows for 32-bit, 16 for bf16, 32 for int8/fp8.
    return 8 * max(1, 4 // jnp.dtype(dtype).itemsize)


def _pick_tm(rows, per_row_bytes, fixed_bytes, budget, sublane):
    """Largest row tile whose double-buffered streaming set fits `budget`,
    capped so the grid keeps >= _MIN_STEPS steps when rows allow."""
    avail = max(budget - fixed_bytes, 2 * sublane * per_row_bytes)
    tm_vmem = max(sublane, avail // (2 * per_row_bytes))
    tm_steps = max(sublane, -(-rows // _MIN_STEPS))  # ceil(rows / _MIN_STEPS)
    tm = min(rows, tm_vmem, tm_steps)
    if tm >= rows:
        return rows
    return max(sublane, (tm // sublane) * sublane)


# ---------------------------------------------------------------------------
# Kernels
# ---------------------------------------------------------------------------
def _residual_proj_kernel(x_ref, res_ref, w_ref, b_ref, o_ref):
    # res_proj = res @ W + b          (MXU, fp32 accumulation; b already f32)
    # out      = (x + res_proj) * sqrt(0.5)
    res_proj = jnp.dot(
        res_ref[...], w_ref[...], preferred_element_type=jnp.float32
    ) + b_ref[...]
    o_ref[...] = ((x_ref[...].astype(jnp.float32) + res_proj)
                  * jnp.float32(SCALE)).astype(o_ref.dtype)


def _residual_add_kernel(x_ref, res_ref, o_ref):
    # out = (x + res) * sqrt(0.5)     (pure VPU elementwise, f32 math)
    o_ref[...] = ((x_ref[...].astype(jnp.float32)
                   + res_ref[...].astype(jnp.float32))
                  * jnp.float32(SCALE)).astype(o_ref.dtype)


# ---------------------------------------------------------------------------
# Wrapper
# ---------------------------------------------------------------------------
def residual_forward(x, res, i, w_t, b):
    """x: (B, S, H); res: (B, S, E) if i==1 else (B, S, H);
    w_t: (E, H) (already transposed nn.Linear weight); b: (H,).
    `i` must be a static Python int (branch chosen at trace time)."""
    B, S, H = x.shape
    M = B * S
    phys = _phys_vmem_bytes()
    budget = int(phys * 0.80)          # ~51 MiB on v7x, ~102 MiB on v5e/v6e
    itemsize = jnp.dtype(x.dtype).itemsize
    sublane = _sublane(x.dtype)

    if i == 1:
        # Projection path: stream rows, keep W/b VMEM-resident when they fit;
        # otherwise tile H so the weight streams in lane-aligned blocks.
        E = res.shape[-1]
        x2 = x.reshape(M, H)
        res2 = res.reshape(M, E)
        b2 = b.reshape(1, H).astype(jnp.float32)   # pre-cast: no per-step cast

        w_bytes = jnp.dtype(w_t.dtype).itemsize
        # Pallas double-buffers every input, including the "resident" W / b.
        resident = 2 * (E * H * w_bytes + H * 4)
        tn = H
        if resident > 0.4 * budget:
            # Weight too big to keep fully resident (e.g. v7x 64 MiB VMEM):
            # stream it along H in (E, tn) blocks, tn a multiple of 128.
            tn_rows = max(1, min(8 * 1024 * 1024, budget // 8) // (E * w_bytes))
            tn = max(128, min(H, (tn_rows // 128) * 128))
            resident = 2 * (E * tn * w_bytes + tn * 4)

        per_row = (tn + E + tn) * itemsize          # x block + res block + out block
        tm = _pick_tm(M, per_row, resident, budget, sublane)
        vmem_limit = min(phys, max(resident + 2 * tm * per_row + _HEADROOM,
                                   32 * 1024 * 1024))

        out2 = pl.pallas_call(
            _residual_proj_kernel,
            out_shape=jax.ShapeDtypeStruct((M, H), x.dtype),
            grid=(pl.cdiv(H, tn), pl.cdiv(M, tm)),   # W block constant over inner m
            in_specs=[
                pl.BlockSpec((tm, tn), lambda n, m: (m, n)),   # x   : streamed
                pl.BlockSpec((tm, E), lambda n, m: (m, 0)),    # res : streamed
                pl.BlockSpec((E, tn), lambda n, m: (0, n)),    # W   : resident / H-tiled
                pl.BlockSpec((1, tn), lambda n, m: (0, n)),    # b   (f32)
            ],
            out_specs=pl.BlockSpec((tm, tn), lambda n, m: (m, n)),
            input_output_aliases={0: 0},            # reuse x's buffer for the output
            compiler_params=pltpu.CompilerParams(
                dimension_semantics=("parallel", "parallel"),
                vmem_limit_bytes=vmem_limit,
            ),
        )(x2, res2, w_t, b2)
        return out2.reshape(B, S, H)

    # i != 1: pure elementwise add+scale.  Present the widest lane-dense 2-D
    # view (last dim a large multiple of 128) so every store is unmasked.
    total = M * H
    lane = next((lw for lw in (8192, 4096, 2048, 1024, 512, 256, 128)
                 if total % lw == 0), None)
    if lane is None:
        rows, lane = M, H   # TODO(synk): H % 128 != 0 -> masked stores on this path
    else:
        rows = total // lane
    x2 = x.reshape(rows, lane)
    res2 = res.reshape(rows, lane)

    per_row = 3 * lane * itemsize                   # x block + res block + out block
    tm = _pick_tm(rows, per_row, 0, budget, sublane)
    vmem_limit = min(phys, max(2 * tm * per_row + _HEADROOM, 32 * 1024 * 1024))

    out2 = pl.pallas_call(
        _residual_add_kernel,
        out_shape=jax.ShapeDtypeStruct((rows, lane), x.dtype),
        grid=(pl.cdiv(rows, tm),),
        in_specs=[
            pl.BlockSpec((tm, lane), lambda m: (m, 0)),
            pl.BlockSpec((tm, lane), lambda m: (m, 0)),
        ],
        out_specs=pl.BlockSpec((tm, lane), lambda m: (m, 0)),
        input_output_aliases={0: 0},                # reuse x's buffer for the output
        compiler_params=pltpu.CompilerParams(
            dimension_semantics=("parallel",),
            vmem_limit_bytes=vmem_limit,
        ),
    )(x2, res2)
    return out2.reshape(B, S, H)


# ---------------------------------------------------------------------------
# Main
# ---------------------------------------------------------------------------
if __name__ == "__main__":
    B, S = 2, 8
    EMBED_DIM, HIDDEN = 32, 64

    key = jax.random.PRNGKey(0)
    kx, kres, kres0, kw = jax.random.split(key, 4)

    # Deterministic parameter init (RE2 Linear: normal(std=sqrt(1/in)) weight,
    # zero bias; weight_norm at init is an identity reparametrization).
    w = jax.random.normal(kw, (HIDDEN, EMBED_DIM), jnp.float32) * math.sqrt(
        1.0 / EMBED_DIM
    )
    w_t = jnp.transpose(w)                     # (E, H)
    b = jnp.zeros((HIDDEN,), jnp.float32)

    x = jax.random.normal(kx, (B, S, HIDDEN), jnp.float32)
    res_embed = jax.random.normal(kres, (B, S, EMBED_DIM), jnp.float32)
    res_hidden = jax.random.normal(kres0, (B, S, HIDDEN), jnp.float32)

    # References first (defensive vs. output aliasing in eager mode).
    ref1 = (x + (res_embed @ w_t + b)) * SCALE
    ref2 = (x + res_hidden) * SCALE

    # i == 1 branch (projection of the residual stream)
    out1 = residual_forward(x, res_embed, 1, w_t, b)
    jax.block_until_ready(out1)
    assert jnp.allclose(out1, ref1, atol=1e-5, rtol=1e-5)

    # i != 1 branch (plain residual add)
    out2 = residual_forward(x, res_hidden, 2, w_t, b)
    jax.block_until_ready(out2)
    assert jnp.allclose(out2, ref2, atol=1e-6, rtol=1e-6)

    print("KERNEL_OK")
</pallas_src>

<mosaic_0001>
module attributes {stable_mosaic.version = 11 : i64} {
  func.func @_residual_proj_kernel(%arg0: i32, %arg1: i32, %arg2: memref<8x64xf32, #tpu.memory_space<vmem>>, %arg3: memref<8x32xf32, #tpu.memory_space<vmem>>, %arg4: memref<32x64xf32, #tpu.memory_space<vmem>>, %arg5: memref<1x64xf32, #tpu.memory_space<vmem>>, %arg6: memref<8x64xf32, #tpu.memory_space<vmem>>) attributes {dimension_semantics = [#tpu.dimension_semantics<parallel>, #tpu.dimension_semantics<parallel>], iteration_bounds = array<i64: 1, 2>, scalar_prefetch = 0 : i64, scratch_operands = 0 : i64, tpu.core_type = #tpu.core_type<tc>, window_params = [{transform_indices = @transform_0, window_bounds = array<i64: 8, 64>}, {transform_indices = @transform_1, window_bounds = array<i64: 8, 32>}, {transform_indices = @transform_2, window_bounds = array<i64: 32, 64>}, {transform_indices = @transform_3, window_bounds = array<i64: 1, 64>}, {transform_indices = @transform_4, window_bounds = array<i64: 8, 64>}]} {
    %c0 = arith.constant 0 : index
    %c0_0 = arith.constant 0 : index
    %0 = vector.load %arg3[%c0, %c0_0] : memref<8x32xf32, #tpu.memory_space<vmem>>, vector<8x32xf32>
    %c0_1 = arith.constant 0 : index
    %c0_2 = arith.constant 0 : index
    %1 = vector.load %arg4[%c0_1, %c0_2] : memref<32x64xf32, #tpu.memory_space<vmem>>, vector<32x64xf32>
    %cst = arith.constant dense<0.000000e+00> : vector<8x64xf32>
    %2 = tpu.matmul %0, %1, %cst {dimension_numbers = #tpu.dot_dimension_numbers<[1], [0], [0], [1], [0, 0, 1, 1], [], []>} : vector<8x32xf32>, vector<32x64xf32>, vector<8x64xf32> -> vector<8x64xf32>
    %c0_3 = arith.constant 0 : index
    %c0_4 = arith.constant 0 : index
    %3 = vector.load %arg5[%c0_3, %c0_4] : memref<1x64xf32, #tpu.memory_space<vmem>>, vector<1x64xf32>
    %4 = vector.broadcast %3 : vector<1x64xf32> to vector<8x64xf32>
    %5 = arith.addf %2, %4 : vector<8x64xf32>
    %c0_5 = arith.constant 0 : index
    %c0_6 = arith.constant 0 : index
    %6 = vector.load %arg2[%c0_5, %c0_6] : memref<8x64xf32, #tpu.memory_space<vmem>>, vector<8x64xf32>
    %7 = arith.addf %6, %5 : vector<8x64xf32>
    %cst_7 = arith.constant 0.707106769 : f32
    %8 = vector.broadcast %cst_7 : f32 to vector<8x64xf32>
    %9 = arith.mulf %7, %8 : vector<8x64xf32>
    %c0_8 = arith.constant 0 : index
    %c0_9 = arith.constant 0 : index
    %10 = vector.load %arg6[%c0_8, %c0_9] : memref<8x64xf32, #tpu.memory_space<vmem>>, vector<8x64xf32>
    tpu.vector_store %arg6[%c0_8, %c0_9], %9 {strides = array<i32>} : memref<8x64xf32, #tpu.memory_space<vmem>>, vector<8x64xf32>,
    return
  }
  func.func @transform_0(%arg0: i32, %arg1: i32) -> (i32, i32) {
    %c0_i32 = arith.constant 0 : i32
    return %arg1, %arg0 : i32, i32
  }
  func.func @transform_1(%arg0: i32, %arg1: i32) -> (i32, i32) {
    %c0_i32 = arith.constant 0 : i32
    %c0_i32_0 = arith.constant 0 : i32
    return %arg1, %c0_i32 : i32, i32
  }
  func.func @transform_2(%arg0: i32, %arg1: i32) -> (i32, i32) {
    %c0_i32 = arith.constant 0 : i32
    %c0_i32_0 = arith.constant 0 : i32
    return %c0_i32, %arg0 : i32, i32
  }
  func.func @transform_3(%arg0: i32, %arg1: i32) -> (i32, i32) {
    %c0_i32 = arith.constant 0 : i32
    %c0_i32_0 = arith.constant 0 : i32
    return %c0_i32, %arg0 : i32, i32
  }
  func.func @transform_4(%arg0: i32, %arg1: i32) -> (i32, i32) {
    %c0_i32 = arith.constant 0 : i32
    return %arg1, %arg0 : i32, i32
  }
}

</mosaic_0001>

<bundles_post_ra>
// kernel: tpu_custom_call.1
= control target key start
LH: loop header
LB: loop body
LE: loop exit
PB: predicated region body
PF: predicated region fallthrough
CT: control target
= control target key end

     0   :  { %9 = vsyncpa [#allocation3], 0  ;;  %s1065_s0 = inlined_call_operand.hbm [shape: f32[16,64], index: 0, kind: input, shape index: {}, may-alias: {0,4}]   ;;  %s1066_s1 = inlined_call_operand.hbm [shape: f32[16,32], index: 1, kind: input, shape index: {}]   ;;  %s1067_s2 = inlined_call_operand.vmem [shape: f32[32,64], index: 2, kind: input, shape index: {}]   ;;  %s1068_s3 = inlined_call_operand.vmem [shape: f32[1,64], index: 3, kind: input, shape index: {}]   ;;  %s1069_s4 = inlined_call_operand.hbm [shape: f32[16,64], index: 4, kind: output, shape index: {}, may-alias: {0,4}]  }
   0x1   :  { %11 = vsyncpa [#allocation3 + $0x1], 0 }
   0x2   :  { %12 = vsyncpa [#allocation6], 0 }
   0x3   :  { %14 = vsyncpa [#allocation6 + $0x1], 0 }
   0x4   :  { %15 = vsyncpa [#allocation4], 0 }
   0x5   :  { %17 = vsyncpa [#allocation4 + $0x1], 0  ;;  %s825_s15 = smov 0   ;;  %s827_s16 = smov 0  }
   0x6   :  { %s829_s17 = smov 0   ;;  %s831_s18 = smov 0  }
   0x7   :  { %s833_s19 = smov 0   ;;  %s835_s20 = smov 0  }
   0x8 LB: > { %s534_s21 = sadd.s32 4294967295, %s792_s20   ;;  %s535_s22 = sadd.s32 4294967294, %s792_s20   ;;  %s792_s20 = sphi %s835_s20, %s23_s20   ;;  %s788_s19 = sphi %s833_s19, %s1089_s19   ;;  %s784_s18 = sphi %s831_s18, %s1088_s18   ;;  %s780_s17 = sphi %s829_s17, %s1087_s17   ;;  %s776_s16 = sphi %s827_s16, %s1086_s16   ;;  %s772_s15 = sphi %s825_s15, %s1085_s15  }
   0x9   : > { %s32_s23 = sadd.s32 1, %s788_s19  ;;  %s44_s24 = sadd.s32 1, %s780_s17 }
   0xa   : > { %p33_p0 = scmp.ge.s32.totalorder %s32_s23, 2  ;;  %p51_p1 = scmp.ne.s32.totalorder %s780_s17, %s776_s16 }
   0xb   : > { %p52_p2 = scmp.eq.s32.totalorder %s792_s20, 0  ;;  %p57_p3 = scmp.ne.s32.totalorder %s776_s16, %s772_s15 }
   0xc   : > { %s1091_s23 = smov (%p33_p0, %s32_s23), 0  ;;  %p58_p5 = scmp.eq.s32.totalorder %s534_s21, 0 }
   0xd   : > { %p866_p4 = por %p52_p2, %p51_p1  ;;  %s39_s26 = ssub.s32 %s788_s19, %s1091_s23 }
   0xe   : > { %p161_p6 = scmp.eq.s32.totalorder %s534_s21, 1  ;;  %p42_p7 = scmp.eq.s32.totalorder %s39_s26, 0 }
   0xf   : > { %p872_p8 = por %p58_p5, %p57_p3  ;;  %p167_p10 = scmp.eq.s32.totalorder %s535_s22, 1 }
  0x10   : > { %p876_p9 = por %p161_p6, %p51_p1  ;;  %p593_p13 = scmp.lt.s32.totalorder %s792_s20, 2 }
  0x11   : > { %s1073_s27 = scalar_select %p872_p8, 1, 0 }
  0x12   : > { %s1074_s28 = scalar_select %p876_p9, 1, 0 }
  0x13   : > { %s881_s29 = scalar_select %p42_p7, %s780_s17, %s44_s24  }
  0x14   : > { %p883_p11 = por %p167_p10, %p57_p3  ;;  %s890_s5 = sand.u32 1, %s780_s17  }
  0x15   : > { %s540_s6 = sshll.u32 %s890_s5, 3  ;;  %s541_s7 = sshll.u32 %s788_s19, 7 }
  0x16   : > { %s1075_s30 = scalar_select %p883_p11, 1, 0 }
  0x17   : > { %s899_s10 = scalar_lea.hbm %s1065_s0, %s541_s7  ;;  %s204_s11 = scalar_lea.vmem [#allocation2], %s540_s6 }
  0x18   : > { %s212_s12 = sshll.u32 %s204_s11, 4  ;;  %p907_p0 = pnand %p593_p13, %p866_p4  ;;  %s903_s12 = int_to_ptr.vmem [resolvable:$true] %s212_s12 }
  0x19   : > { %s201_s14 = scalar_lea.sflag [#allocation3], %s890_s5  ;;  %s646_s21 = scalar_lea.hbm %s899_s10, 128 }
  0x1a   : > { %p647_p3 = scmp.ne.s32.totalorder %s899_s10, %s646_s21  ;;  %p648_p5 = pneg %p907_p0 }
  0x1b   : > { %s651_s25 = scalar_lea.hbm %s1065_s0, 256  ;;  %p652_p4 = scmp.lt.u32.totalorder %s899_s10, %s1065_s0 }
  0x1c   : > { %p649_p6 = pnand %p648_p5, %p647_p3  ;;  %p653_p10 = scmp.lt.u32.totalorder %s651_s25, %s646_s21 }
  0x1d   : > { %p655_p12 = scmp.lt.u32.totalorder %s646_s21, %s899_s10 }
  0x1e   : > { %p650_p7 = pneg %p649_p6  ;;  %p654_p13 = por %p653_p10, %p652_p4 }
  0x20   : > { %p656_p1 = por %p655_p12, %p654_p13 }
  0x22   : > { %p657_p2 = pnand %p656_p1, %p650_p7 }
  0x24   : > { %660 = shalt.err (!%p657_p2)
}
  0x25   : > { %s661_s9 = scalar_lea.vmem %s903_s12, 128  ;;  %s794_s11 = smov [#allocation2]  }
  0x26   : > { %p662_p3 = scmp.ne.s32.totalorder %s903_s12, %s661_s9  ;;  %s666_s22 = sshll.u32 %s794_s11, 4  ;;  %s667_s22 = int_to_ptr.vmem [resolvable:$false] %s666_s22 }
  0x27   : > { %s668_s24 = scalar_lea.vmem %s667_s22, 256  ;;  %p669_p9 = scmp.lt.s32.totalorder %s903_s12, %s667_s22 }
  0x28   : > { %p664_p6 = pnand %p662_p3, %p648_p5  ;;  %p670_p4 = scmp.lt.s32.totalorder %s668_s24, %s661_s9 }
  0x2a   : > { %p665_p11 = pneg %p664_p6  ;;  %p671_p10 = por %p670_p4, %p669_p9 }
  0x2c   : > { %p672_p12 = pnand %p671_p10, %p665_p11 }
  0x2e   : > { %675 = shalt.err (!%p672_p12)
}
  0x2f   : > { %585 = dma.hbm_to_vmem [thread:$0]  (!%p907_p0), %s899_s10, 128, %s903_s12, %s201_s14  }
  0x30   : > { %p1077_p1 = scmp.lt.s32.totalorder %s792_s20, 3  ;;  %p1078_p2 = scmp.ge.s32.totalorder %s792_s20, 1 }
  0x31   : > { %s952_s8 = scalar_lea.hbm %s1066_s1, %s541_s7  ;;  %s223_s9 = scalar_lea.vmem [#allocation5], %s540_s6 }
  0x32   : > { %p943_p7 = pnand %p1078_p2, %p1077_p1  ;;  %s230_s11 = sshll.u32 %s223_s9, 4  ;;  %s231_s11 = int_to_ptr.vmem [resolvable:$true] %s230_s11 }
  0x33   : > { %s220_s10 = scalar_lea.sflag [#allocation6], %s890_s5  ;;  %s676_s12 = scalar_lea.hbm %s952_s8, 128 }
  0x34   : > { %s1079_s21 = scalar_select %p943_p7, 1, 0 }
  0x35   : > { %p677_p9 = scmp.ne.s32.totalorder %s952_s8, %s676_s12  ;;  %s681_s7 = scalar_lea.hbm %s1066_s1, 256 }
  0x36   : > { %p682_p3 = scmp.lt.u32.totalorder %s952_s8, %s1066_s1  ;;  %p683_p6 = scmp.lt.u32.totalorder %s681_s7, %s676_s12 }
  0x37   : > { %p679_p11 = pnand %p677_p9, %p648_p5  ;;  %p685_p10 = scmp.lt.u32.totalorder %s676_s12, %s952_s8 }
  0x38   : > { %p684_p4 = por %p683_p6, %p682_p3 }
  0x39   : > { %p680_p13 = pneg %p679_p11 }
  0x3a   : > { %p686_p12 = por %p685_p10, %p684_p4 }
  0x3c   : > { %p687_p1 = pnand %p686_p12, %p680_p13 }
  0x3e   : > { %690 = shalt.err (!%p687_p1)
}
  0x3f   : > { %s691_s5 = scalar_lea.vmem %s231_s11, 128  ;;  %s795_s6 = smov [#allocation5]  }
  0x40   : > { %p692_p2 = scmp.ne.s32.totalorder %s231_s11, %s691_s5  ;;  %s696_s26 = sshll.u32 %s795_s6, 4  ;;  %s697_s26 = int_to_ptr.vmem [resolvable:$false] %s696_s26 }
  0x41   : > { %s698_s9 = scalar_lea.vmem %s697_s26, 256  ;;  %p699_p8 = scmp.lt.s32.totalorder %s231_s11, %s697_s26 }
  0x42   : > { %p694_p9 = pnand %p692_p2, %p648_p5  ;;  %p700_p7 = scmp.lt.s32.totalorder %s698_s9, %s691_s5 }
  0x44   : > { %p695_p11 = pneg %p694_p9  ;;  %p701_p3 = por %p700_p7, %p699_p8 }
  0x46   : > { %p702_p6 = pnand %p701_p3, %p695_p11 }
  0x48   : > { %705 = shalt.err (!%p702_p6)
}
  0x49   : > { %588 = dma.hbm_to_vmem [thread:$0]  (!%p907_p0), %s952_s8, 128, %s231_s11, %s220_s10  }
  0x4a   : > { %p1080_p13 = scmp.ne.s32.totalorder %s1079_s21, 0 }
  0x4b   : > { %s979_s12 = sand.u32 (!%p1080_p13), 1, %s776_s16   ;;  %p1081_p8 = scmp.ne.s32.totalorder (!%p1080_p13), %s1073_s27, 0 }
  0x4c   : > { %239 = sbr.rel (%p1080_p13) target bundleno = 328 (0x148), region = 36  ;;  %s982_s14 = sshll.u32 (!%p1080_p13), %s979_s12, 3 }
  0x4d   : > { %s242_s22 = scalar_lea.sflag (!%p1080_p13), [#allocation3], %s979_s12  ;;  %s245_s7 = scalar_lea.vmem (!%p1080_p13), [#allocation2], %s982_s14 }
  0x53   : > { %759 = dma.done.wait (%p1081_p8), %s242_s22, 128  }
  0x54   : > { %761 = vsyncadd (%p1081_p8), %s242_s22, 4294967168  ;;  %s251_s13 = scalar_lea.sflag [#allocation6], %s979_s12  ;;  %s254_s21 = scalar_lea.vmem [#allocation5], %s982_s14 }
  0x55   : > { %763 = dma.done.wait (%p1081_p8), %s251_s13, 128  }
  0x56   : > { %765 = vsyncadd (%p1081_p8), %s251_s13, 4294967168  ;;  %v796_v0 = vmov 0.0|0.0   ;;  %vm797_vm0 = vmmov 0   ;;  %v798_v1 = vmov 0.0   ;;  %v299_v2 = vld [vmem:[%s1067_s2] sm:$0xff]  ;;  %v300_v3 = vld [vmem:[%s1067_s2 + $0x8] sm:$0xff] }
  0x57   : > { %570 = vmatprep.subr.bf16.mxu0 %v796_v0  ;;  %567 = vmatprep.mubr.msk.f32.mxu0 %vm797_vm0, %v798_v1  ;;  %v301_v4 = vld [vmem:[%s1067_s2 + $0x10] sm:$0xff]  ;;  %v571_v5 = vpack.c.bf16 %v300_v3, %v299_v2  ;;  %v302_v6 = vld [vmem:[%s1067_s2 + $0x18] sm:$0xff]  ;;  %vm310_vm1 = vcmask 261120   ;;  %v548_v9 = vld [vmem:[%s1068_s3] ss:$0 sm:$0xff]  ;;  %s551_s22 = sshll.u32 %s784_s18, 7 }
  0x58   : > { %v574_v7 = vpack.c.bf16 %v302_v6, %v301_v4  ;;  %v298_v8 = vld [vmem:[%s254_s21] sm:$0xff]  ;;  %v384_v11 = vld [vmem:[%s245_s7] sm:$0xff]  ;;  %s290_s13 = scalar_lea.vmem [#allocation7], %s982_s14  ;;  %vm387_vm2 = vcmask 523264   ;;  %s1016_s10 = scalar_lea.hbm %s1069_s4, %s551_s22 }
  0x59   : > { %572 = vmatpush3.bf16.msra.mxu0 %v571_v5  ;;  %s404_s8 = sshll.u32 %s290_s13, 4  ;;  %s390_s7 = scalar_lea.sflag [#allocation4], %s979_s12  ;;  %s1018_s8 = int_to_ptr.vmem [resolvable:$true] %s404_s8 }
  0x5a   : > { %573 = vmatprep.subr.bf16.mxu0 %v796_v0  ;;  %s706_s24 = scalar_lea.vmem %s1018_s8, 128  ;;  %p1082_p5 = scmp.ne.s32.totalorder %s1074_s28, 0 }
  0x5b   : > { %p707_p0 = scmp.ne.s32.totalorder %s1018_s8, %s706_s24  ;;  %s799_s18 = smov [#allocation7]  }
  0x5c   : > { %s710_s14 = sshll.u32 %s799_s18, 4  ;;  %s711_s14 = int_to_ptr.vmem [resolvable:$false] %s710_s14 }
  0x5d   : > { %575 = vmatpush3.bf16.msra.mxu0 %v574_v7  ;;  %p708_p7 = pnand %p707_p0, %p1082_p5  ;;  %s712_s25 = scalar_lea.vmem %s711_s14, 256 }
  0x5e   : > { %p713_p10 = scmp.lt.s32.totalorder %s1018_s8, %s711_s14  ;;  %p714_p12 = scmp.lt.s32.totalorder %s712_s25, %s706_s24 }
  0x5f   : > { %p709_p4 = pneg %p708_p7 }
  0x60   : > { %568 = vmatmul.mubr.msk.f32.vlgmr.msra.gmra.mrb[0].mxu0 %vm310_vm1, %v298_v8  ;;  %p715_p1 = por %p714_p12, %p713_p10 }
  0x62   : > { %p716_p2 = pnand %p715_p1, %p709_p4 }
 0x133   : > { %v380_v10 = vpop.f32.mrb[0].mxu0 }
 0x134   : > { %v381_v12 = vadd.f32 %v548_v9, %v380_v10  ;;  %v569_v13 = vpop.f32.mrb[1].mxu0 }
 0x136   : > { %v385_v14 = vadd.f32 %v384_v11, %v381_v12 }
 0x138   : > { %v386_v15 = vmul.f32 0.70710677, %v385_v14 }
 0x13a   : > { %388 = vst.msk [vmem:[%s290_s13] sm:$0xff] %vm387_vm2, %v386_v15 }
 0x13b   : > { %719 = shalt.err (!%p716_p2)
}
 0x13c   : > { %s720_s12 = scalar_lea.hbm %s1016_s10, 128  ;;  %s724_s6 = scalar_lea.hbm %s1069_s4, 256 }
 0x13d   : > { %p721_p9 = scmp.ne.s32.totalorder %s1016_s10, %s720_s12  ;;  %p725_p6 = scmp.lt.u32.totalorder %s1016_s10, %s1069_s4 }
 0x13e   : > { %p726_p13 = scmp.lt.u32.totalorder %s724_s6, %s720_s12  ;;  %p728_p0 = scmp.lt.u32.totalorder %s720_s12, %s1016_s10 }
 0x13f   : > { %p722_p11 = pnand %p721_p9, %p1082_p5 }
 0x140   : > { %p727_p8 = por %p726_p13, %p725_p6 }
 0x141   : > { %p723_p3 = pneg %p722_p11 }
 0x142   : > { %p729_p7 = por %p728_p0, %p727_p8 }
 0x144   : > { %p730_p4 = pnand %p729_p7, %p723_p3 }
 0x146   : > { %733 = shalt.err (!%p730_p4)
}
 0x147   : > { %580 = dma.vmem_to_hbm [thread:$0]  (%p1082_p5), %s1018_s8, 128, %s1016_s10, %s390_s7  }
 0x148 PF: > { %s416_s22 = sand.u32 1, %s772_s15   ;;  %p1083_p10 = scmp.ne.s32.totalorder %s1075_s30, 0 }
 0x149   : > { %p1084_p12 = scmp.ge.s32.totalorder %s792_s20, 2  ;;  %s417_s13 = scalar_lea.sflag [#allocation4], %s416_s22 }
 0x14b   : > { %p590_p1 = pnand %p1084_p12, %p1083_p10 }
 0x14d   : > { %767 = dma.done.wait (!%p590_p1), %s417_s13, 128  }
 0x14e   : > { %769 = vsyncadd (!%p590_p1), %s417_s13, 4294967168  ;;  %s23_s20 = sadd.s32 1, %s792_s20   ;;  %s1085_s15 = smov %s776_s16 }
 0x14f   : > { %p20_p2 = scmp.ge.s32.totalorder %s23_s20, 4   ;;  %s1086_s16 = smov %s780_s17 }
 0x150   : > { %s1087_s17 = smov %s881_s29  ;;  %s1088_s18 = smov %s788_s19 }
 0x151   : > { %s1089_s19 = smov %s1091_s23  ;;  %22 = sbr.rel (!%p20_p2) target bundleno = 8 (0x8), region = 100 }
 0x158   :  { %422 = vsyncpa [#allocation3], 1 }
 0x159   :  { %424 = vsyncpa [#allocation3 + $0x1], 1 }
 0x15a   :  { %425 = vsyncpa [#allocation6], 1 }
 0x15b   :  { %427 = vsyncpa [#allocation6 + $0x1], 1 }
 0x15c   :  { %428 = vsyncpa [#allocation4], 1 }
 0x15d   :  { %430 = vsyncpa [#allocation4 + $0x1], 1 }

</bundles_post_ra>
